<compile_context>
chip_gen: v7x
topology: tpu7x:2x2x1
jax: 0.10.0
libtpu: 0.0.40
codegen_flags: <defaults>
</compile_context>

<pallas_src>
import functools

import jax
import jax.numpy as jnp
from jax.experimental import pallas as pl
from jax.experimental.pallas import tpu as pltpu

K_FEATURES = 4096
N_CLASSES = 10
HEAD_NAMES = (
    "switch", "advance", "faceoff", "play_make", "play_receive",
    "whistle", "shot", "hit", "shot_block", "penalty", "ricochet",
)
N_HEADS = len(HEAD_NAMES)          # 11
N_OUT = N_HEADS * N_CLASSES        # 110
N_PAD = 128                        # pad output lanes to 128 (fills one MXU pass)
MAX_BM = 256                       # max batch-tile rows (keeps x tile <= 4 MiB f32)


def _round_up(x, m):
    return ((x + m - 1) // m) * m


def _heads_kernel(x_ref, w_ref, b_ref, o_ref):
    """One batch tile: o = x_tile @ W + b, full K in one shot, f32 accumulate."""
    o_ref[...] = (
        jnp.dot(
            x_ref[...],
            w_ref[...].astype(jnp.float32),   # bf16 weights upcast in-VMEM
            preferred_element_type=jnp.float32,
        )
        + b_ref[...]
    ).astype(o_ref.dtype)


def fused_heads(x, w_all, b_all):
    """x: [B, 4096] f32, w_all: [4096, N_PAD] bf16, b_all: [1, N_PAD] f32.

    Returns [B, N_PAD] f32 = x @ w_all + b_all computed in Pallas.
    """
    B, K = x.shape
    assert K == K_FEATURES

    # Tile the batch (M) dimension in multiples of 8 sublanes so output stores
    # are full-vreg (no masked vst), and mark it "parallel" for v7x megacore.
    bm = min(MAX_BM, _round_up(B, 8))
    m_pad = _round_up(B, bm)
    if m_pad != B:
        x = jnp.pad(x, ((0, m_pad - B), (0, 0)))
    grid = (m_pad // bm,)

    out = pl.pallas_call(
        _heads_kernel,
        out_shape=jax.ShapeDtypeStruct((m_pad, N_PAD), jnp.float32),
        grid=grid,
        in_specs=[
            pl.BlockSpec((bm, K), lambda i: (i, 0)),       # x batch tile
            pl.BlockSpec((K, N_PAD), lambda i: (0, 0)),    # W resident (whole K)
            pl.BlockSpec((1, N_PAD), lambda i: (0, 0)),    # bias resident
        ],
        out_specs=pl.BlockSpec((bm, N_PAD), lambda i: (i, 0)),
        compiler_params=pltpu.CompilerParams(
            dimension_semantics=("parallel",),
        ),
    )(x, w_all, b_all)
    return out[:B]


def init_params(key):
    """Deterministic init mimicking nn.Linear default (uniform +- 1/sqrt(fan_in))."""
    bound = 1.0 / jnp.sqrt(jnp.float32(K_FEATURES))
    weights = []
    biases = []
    for i in range(N_HEADS):
        kw, kb = jax.random.split(jax.random.fold_in(key, i))
        # PyTorch stores weight as [out_features, in_features].
        w = jax.random.uniform(
            kw, (N_CLASSES, K_FEATURES), jnp.float32, -bound, bound
        )
        b = jax.random.uniform(kb, (N_CLASSES,), jnp.float32, -bound, bound)
        weights.append(w)
        biases.append(b)
    return weights, biases


def pack_params(weights, biases, param_dtype=jnp.bfloat16):
    """Pack the 11 heads ONCE into W [4096, 128] (param_dtype) and b [1, 128] f32.

    Done outside the forward so the per-call repack (11 transposes + concat +
    pad) and its HBM traffic disappear from the hot path.
    """
    w_cat = jnp.concatenate([w.T for w in weights], axis=1)       # [4096, 110]
    b_cat = jnp.concatenate(biases, axis=0)                       # [110]
    w_all = jnp.pad(w_cat, ((0, 0), (0, N_PAD - N_OUT))).astype(param_dtype)
    b_all = jnp.pad(b_cat, (0, N_PAD - N_OUT)).reshape(1, N_PAD)
    b_all = b_all.astype(jnp.float32)
    return w_all, b_all


@functools.partial(jax.jit, static_argnames=())
def hockey_classifier_forward(x, w_all, b_all):
    """Returns the 11-tuple of [B, 10] logits, matching the PyTorch forward."""
    y = fused_heads(x, w_all, b_all)                              # [B, 128]
    y = y[:, :N_OUT]                                              # [B, 110]
    return tuple(
        y[:, i * N_CLASSES:(i + 1) * N_CLASSES] for i in range(N_HEADS)
    )


if __name__ == "__main__":
    key = jax.random.PRNGKey(0)
    kx, kp = jax.random.split(key)

    batch = 2
    x = jax.random.normal(kx, (batch, K_FEATURES), jnp.float32)
    weights, biases = init_params(kp)

    # Pack heads once (not per forward call).
    w_all, b_all = pack_params(weights, biases, param_dtype=jnp.bfloat16)

    outs = hockey_classifier_forward(x, w_all, b_all)
    outs = jax.block_until_ready(outs)

    # Sanity check against a plain-JAX reference using the same packed
    # (bf16-quantized) weights, so the comparison isolates the kernel itself.
    w_ref = w_all[:, :N_OUT].astype(jnp.float32)                  # [4096, 110]
    b_ref = b_all[0, :N_OUT]                                      # [110]
    y_ref = x @ w_ref + b_ref
    refs = tuple(
        y_ref[:, i * N_CLASSES:(i + 1) * N_CLASSES] for i in range(N_HEADS)
    )
    for name, o, r in zip(HEAD_NAMES, outs, refs):
        assert o.shape == (batch, N_CLASSES), (name, o.shape)
        assert jnp.allclose(o, r, atol=1e-3, rtol=1e-3), name

    print("KERNEL_OK")
</pallas_src>

<mosaic_0001>
module attributes {stable_mosaic.version = 11 : i64} {
  func.func @_heads_kernel(%arg0: i32, %arg1: memref<8x4096xf32, #tpu.memory_space<vmem>>, %arg2: memref<4096x128xbf16, #tpu.memory_space<vmem>>, %arg3: memref<1x128xf32, #tpu.memory_space<vmem>>, %arg4: memref<8x128xf32, #tpu.memory_space<vmem>>) attributes {dimension_semantics = [#tpu.dimension_semantics<parallel>], iteration_bounds = array<i64: 1>, scalar_prefetch = 0 : i64, scratch_operands = 0 : i64, tpu.core_type = #tpu.core_type<tc>, window_params = [{transform_indices = @transform_0, window_bounds = array<i64: 8, 4096>}, {pipeline_mode = #tpu.pipeline_mode<synchronous>, transform_indices = @transform_1, window_bounds = array<i64: 4096, 128>}, {pipeline_mode = #tpu.pipeline_mode<synchronous>, transform_indices = @transform_2, window_bounds = array<i64: 1, 128>}, {transform_indices = @transform_3, window_bounds = array<i64: 8, 128>}]} {
    %c0 = arith.constant 0 : index
    %c0_0 = arith.constant 0 : index
    %0 = vector.load %arg1[%c0, %c0_0] : memref<8x4096xf32, #tpu.memory_space<vmem>>, vector<8x4096xf32>
    %c0_1 = arith.constant 0 : index
    %c0_2 = arith.constant 0 : index
    %1 = vector.load %arg2[%c0_1, %c0_2] : memref<4096x128xbf16, #tpu.memory_space<vmem>>, vector<4096x128xbf16>
    %2 = arith.extf %1 : vector<4096x128xbf16> to vector<4096x128xf32>
    %cst = arith.constant dense<0.000000e+00> : vector<8x128xf32>
    %3 = tpu.matmul %0, %2, %cst {dimension_numbers = #tpu.dot_dimension_numbers<[1], [0], [0], [1], [0, 0, 1, 1], [], []>} : vector<8x4096xf32>, vector<4096x128xf32>, vector<8x128xf32> -> vector<8x128xf32>
    %c0_3 = arith.constant 0 : index
    %c0_4 = arith.constant 0 : index
    %4 = vector.load %arg3[%c0_3, %c0_4] : memref<1x128xf32, #tpu.memory_space<vmem>>, vector<1x128xf32>
    %5 = vector.broadcast %4 : vector<1x128xf32> to vector<8x128xf32>
    %6 = arith.addf %3, %5 : vector<8x128xf32>
    %c0_5 = arith.constant 0 : index
    %c0_6 = arith.constant 0 : index
    %7 = vector.load %arg4[%c0_5, %c0_6] : memref<8x128xf32, #tpu.memory_space<vmem>>, vector<8x128xf32>
    tpu.vector_store %arg4[%c0_5, %c0_6], %6 {strides = array<i32>} : memref<8x128xf32, #tpu.memory_space<vmem>>, vector<8x128xf32>,
    return
  }
  func.func @transform_0(%arg0: i32) -> (i32, i32) {
    %c0_i32 = arith.constant 0 : i32
    %c0_i32_0 = arith.constant 0 : i32
    return %arg0, %c0_i32 : i32, i32
  }
  func.func @transform_1(%arg0: i32) -> (i32, i32) {
    %c0_i32 = arith.constant 0 : i32
    %c0_i32_0 = arith.constant 0 : i32
    %c0_i32_1 = arith.constant 0 : i32
    return %c0_i32, %c0_i32_0 : i32, i32
  }
  func.func @transform_2(%arg0: i32) -> (i32, i32) {
    %c0_i32 = arith.constant 0 : i32
    %c0_i32_0 = arith.constant 0 : i32
    %c0_i32_1 = arith.constant 0 : i32
    return %c0_i32, %c0_i32_0 : i32, i32
  }
  func.func @transform_3(%arg0: i32) -> (i32, i32) {
    %c0_i32 = arith.constant 0 : i32
    %c0_i32_0 = arith.constant 0 : i32
    return %arg0, %c0_i32 : i32, i32
  }
}

</mosaic_0001>

<bundles_post_ra>
// kernel: hockey_classifier_forward.1
= control target key start
LH: loop header
LB: loop body
LE: loop exit
PB: predicated region body
PF: predicated region fallthrough
CT: control target
= control target key end

     0   :  { %8 = vsyncpa [#allocation3], 0  ;;  %s4596_s12 = smov [#allocation2]   ;;  %s4733_s0 = inlined_call_operand.vmem [shape: f32[8,4096], index: 0, kind: input, shape index: {}]   ;;  %s4734_s1 = inlined_call_operand.hbm [shape: bf16[4096,128], index: 1, kind: input, shape index: {}]   ;;  %s4735_s2 = inlined_call_operand.vmem [shape: f32[1,128], index: 2, kind: input, shape index: {}]   ;;  %s4736_s3 = inlined_call_operand.vmem [shape: f32[8,128], index: 3, kind: output, shape index: {}]  }
   0x1   :  { %s16_s13 = sshll.u32 %s4596_s12, 4  ;;  %s4572_s16 = scalar_lea.hbm %s4734_s1, 32768  ;;  %s17_s13 = int_to_ptr.vmem [resolvable:$true] %s16_s13 }
   0x2   :  { %p4573_p0 = scmp.ne.s32.totalorder %s4734_s1, %s4572_s16  ;;  %p4576_p1 = scmp.lt.u32.totalorder %s4572_s16, %s4734_s1 }
   0x4   :  { %p4578_p2 = pnand %p4576_p1, %p4573_p0 }
   0x6   :  { %4581 = shalt.err (!%p4578_p2)
}
   0x7   :  { %s4582_s21 = scalar_lea.vmem %s17_s13, 32768  ;;  %p4587_p4 = scmp.lt.s32.totalorder %s17_s13, %s17_s13 }
   0x8   :  { %p4583_p3 = scmp.ne.s32.totalorder %s17_s13, %s4582_s21  ;;  %p4588_p5 = scmp.lt.s32.totalorder %s4582_s21, %s4582_s21 }
   0xa   :  { %p4589_p6 = por %p4588_p5, %p4587_p4 }
   0xc   :  { %p4590_p7 = pnand %p4589_p6, %p4583_p3 }
   0xe   :  { %4593 = shalt.err (!%p4590_p7)
}
   0xf   :  { %s4597_s22 = smov 64   ;;  %s4598_s23 = smov 4  }
  0x10   :  { %22 = dma.hbm_to_vmem [thread:$0]  %s4734_s1, 32768, %s17_s13, [#allocation3], %s4597_s22, %s4597_s22, %s4598_s23  }
  0x11   :  { %4594 = dma.done.wait [#allocation3], 32768  }
  0x12   :  { %4595 = vsyncadd [#allocation3], 4294934528  ;;  %v3249_v0 = vld [vmem:[#allocation2 + $0x40] sm:$0xff]   ;;  %v3250_v4 = vld [vmem:[#allocation2 + $0x48] sm:$0xff]  }
  0x13   :  { %v2219_v1 = vld [vmem:[#allocation2] sm:$0xff]   ;;  %4058 = vmatprep.subr.bf16.mxu0 %v3249_v0  ;;  %v3266_v5 = vld [vmem:[#allocation2 + $0xc8] sm:$0xff]   ;;  %v3251_v8 = vld [vmem:[#allocation2 + $0x50] sm:$0xff]  }
  0x14   :  { %v3265_v2 = vld [vmem:[#allocation2 + $0xc0] sm:$0xff]   ;;  %4060 = vmatpush3.bf16.msra.mxu0 %v2219_v1  ;;  %v3242_v6 = vld [vmem:[#allocation2 + $0x8] sm:$0xff]   ;;  %v3267_v9 = vld [vmem:[#allocation2 + $0xd0] sm:$0xff]  }
  0x15   :  { %4090 = vmatprep.subr.bf16.mxu1 %v3265_v2  ;;  %v3257_v3 = vld [vmem:[#allocation2 + $0x80] sm:$0xff]   ;;  %4062 = vmatprep.subr.bf16.mxu0 %v3250_v4  ;;  %v3258_v7 = vld [vmem:[#allocation2 + $0x88] sm:$0xff]   ;;  %v3243_v10 = vld [vmem:[#allocation2 + $0x10] sm:$0xff]  }
  0x16   :  { %4092 = vmatpush3.bf16.msra.mxu1 %v3257_v3  ;;  %v3259_v11 = vld [vmem:[#allocation2 + $0x90] sm:$0xff]   ;;  %v3252_v12 = vld [vmem:[#allocation2 + $0x58] sm:$0xff]   ;;  %v29_v14 = vld [vmem:[%s4733_s0 + $0x8] sm:$0xff] }
  0x17   :  { %4094 = vmatprep.subr.bf16.mxu1 %v3266_v5  ;;  %v3268_v13 = vld [vmem:[#allocation2 + $0xd8] sm:$0xff]   ;;  %v3253_v18 = vld [vmem:[#allocation2 + $0x60] sm:$0xff]   ;;  %1155 = vmatprep.mubr.f32.mxu0 %v29_v14  ;;  %v3254_v22 = vld [vmem:[#allocation2 + $0x68] sm:$0xff]  }
  0x18   :  { %4064 = vmatpush3.bf16.msra.mxu0 %v3242_v6  ;;  %v3244_v15 = vld [vmem:[#allocation2 + $0x18] sm:$0xff]   ;;  %v3269_v19 = vld [vmem:[#allocation2 + $0xe0] sm:$0xff]   ;;  %v3270_v23 = vld [vmem:[#allocation2 + $0xe8] sm:$0xff]  }
  0x19   :  { %4066 = vmatprep.subr.bf16.mxu0 %v3251_v8  ;;  %v3260_v16 = vld [vmem:[#allocation2 + $0x98] sm:$0xff]   ;;  %v3245_v20 = vld [vmem:[#allocation2 + $0x20] sm:$0xff]   ;;  %v3246_v24 = vld [vmem:[#allocation2 + $0x28] sm:$0xff]  }
  0x1a   :  { %4096 = vmatpush3.bf16.msra.mxu1 %v3258_v7  ;;  %v31_v17 = vld [vmem:[%s4733_s0 + $0x18] sm:$0xff]  ;;  %v3261_v21 = vld [vmem:[#allocation2 + $0xa0] sm:$0xff]   ;;  %v3262_v25 = vld [vmem:[#allocation2 + $0xa8] sm:$0xff]  }
  0x1b   :  { %4098 = vmatprep.subr.bf16.mxu1 %v3267_v9  ;;  %1225 = vmatprep.mubr.f32.mxu1 %v31_v17  ;;  %v3255_v26 = vld [vmem:[#allocation2 + $0x70] sm:$0xff]   ;;  %v3256_v30 = vld [vmem:[#allocation2 + $0x78] sm:$0xff]   ;;  %v3281_v34 = vld [vmem:[#allocation2 + $0x140] sm:$0xff]  }
  0x1c   :  { %4068 = vmatpush3.bf16.msra.mxu0 %v3243_v10  ;;  %v3271_v27 = vld [vmem:[#allocation2 + $0xf0] sm:$0xff]   ;;  %v3272_v31 = vld [vmem:[#allocation2 + $0xf8] sm:$0xff]   ;;  %v3297_v35 = vld [vmem:[#allocation2 + $0x1c0] sm:$0xff]  }
  0x1d   :  { %4070 = vmatprep.subr.bf16.mxu0 %v3252_v12  ;;  %v3247_v28 = vld [vmem:[#allocation2 + $0x30] sm:$0xff]   ;;  %v3248_v32 = vld [vmem:[#allocation2 + $0x38] sm:$0xff]   ;;  %v28_v36 = vld [vmem:[%s4733_s0] sm:$0xff] }
  0x1e   :  { %4100 = vmatpush3.bf16.msra.mxu1 %v3259_v11  ;;  %v3263_v29 = vld [vmem:[#allocation2 + $0xb0] sm:$0xff]   ;;  %v3264_v33 = vld [vmem:[#allocation2 + $0xb8] sm:$0xff]   ;;  %v3273_v38 = vld [vmem:[#allocation2 + $0x100] sm:$0xff]  }
  0x1f   :  { %4102 = vmatprep.subr.bf16.mxu1 %v3268_v13  ;;  %v30_v37 = vld [vmem:[%s4733_s0 + $0x10] sm:$0xff]  ;;  %v3289_v39 = vld [vmem:[#allocation2 + $0x180] sm:$0xff]   ;;  %v3282_v40 = vld [vmem:[#allocation2 + $0x148] sm:$0xff]  }
  0x20   :  { %4072 = vmatpush3.bf16.msra.mxu0 %v3244_v15  ;;  %v3298_v41 = vld [vmem:[#allocation2 + $0x1c8] sm:$0xff]   ;;  %v35_v43 = vld [vmem:[%s4733_s0 + $0x38] sm:$0xff]  ;;  %v3283_v46 = vld [vmem:[#allocation2 + $0x150] sm:$0xff]  }
  0x21   :  { %4074 = vmatprep.subr.bf16.mxu0 %v3253_v18  ;;  %v33_v42 = vld [vmem:[%s4733_s0 + $0x28] sm:$0xff]  ;;  %v3299_v47 = vld [vmem:[#allocation2 + $0x1d0] sm:$0xff]   ;;  %v3284_v50 = vld [vmem:[#allocation2 + $0x158] sm:$0xff]  }
  0x22   :  { %4104 = vmatpush3.bf16.msra.mxu1 %v3260_v16  ;;  %v3274_v44 = vld [vmem:[#allocation2 + $0x108] sm:$0xff]   ;;  %v3275_v48 = vld [vmem:[#allocation2 + $0x110] sm:$0xff]   ;;  %v3300_v51 = vld [vmem:[#allocation2 + $0x1d8] sm:$0xff]  }
  0x23   :  { %4106 = vmatprep.subr.bf16.mxu1 %v3269_v19  ;;  %v3290_v45 = vld [vmem:[#allocation2 + $0x188] sm:$0xff]   ;;  %v3291_v49 = vld [vmem:[#allocation2 + $0x190] sm:$0xff]   ;;  %v3276_v52 = vld [vmem:[#allocation2 + $0x118] sm:$0xff]  }
  0x24   :  { %4076 = vmatpush3.bf16.msra.mxu0 %v3245_v20  ;;  %v3292_v53 = vld [vmem:[#allocation2 + $0x198] sm:$0xff]   ;;  %v3285_v54 = vld [vmem:[#allocation2 + $0x160] sm:$0xff]   ;;  %v3286_v58 = vld [vmem:[#allocation2 + $0x168] sm:$0xff]  }
  0x25   :  { %4078 = vmatprep.subr.bf16.mxu0 %v3254_v22  ;;  %v3301_v55 = vld [vmem:[#allocation2 + $0x1e0] sm:$0xff]   ;;  %v3302_v59 = vld [vmem:[#allocation2 + $0x1e8] sm:$0xff]   ;;  %v3287_v62 = vld [vmem:[#allocation2 + $0x170] sm:$0xff]  }
  0x26   :  { %4108 = vmatpush3.bf16.msra.mxu1 %v3261_v21  ;;  %v3277_v56 = vld [vmem:[#allocation2 + $0x120] sm:$0xff]   ;;  %v3278_v60 = vld [vmem:[#allocation2 + $0x128] sm:$0xff]   ;;  %v3303_v63 = vld [vmem:[#allocation2 + $0x1f0] sm:$0xff]  }
  0x27   :  { %4110 = vmatprep.subr.bf16.mxu1 %v3270_v23  ;;  %v3293_v57 = vld [vmem:[#allocation2 + $0x1a0] sm:$0xff]   ;;  %v3294_v61 = vld [vmem:[#allocation2 + $0x1a8] sm:$0xff]   ;;  %v3279_v0 = vld [vmem:[#allocation2 + $0x130] sm:$0xff]  }
  0x28   :  { %4080 = vmatpush3.bf16.msra.mxu0 %v3246_v24  ;;  %v3295_v1 = vld [vmem:[#allocation2 + $0x1b0] sm:$0xff]   ;;  %v3288_v2 = vld [vmem:[#allocation2 + $0x178] sm:$0xff]   ;;  %v3313_v6 = vld [vmem:[#allocation2 + $0x240] sm:$0xff]  }
  0x29   :  { %4082 = vmatprep.subr.bf16.mxu0 %v3255_v26  ;;  %v3304_v3 = vld [vmem:[#allocation2 + $0x1f8] sm:$0xff]   ;;  %v3329_v7 = vld [vmem:[#allocation2 + $0x2c0] sm:$0xff]   ;;  %v34_v9 = vld [vmem:[%s4733_s0 + $0x30] sm:$0xff] }
  0x2a   :  { %4112 = vmatpush3.bf16.msra.mxu1 %v3262_v25  ;;  %v3280_v4 = vld [vmem:[#allocation2 + $0x138] sm:$0xff]   ;;  %v32_v8 = vld [vmem:[%s4733_s0 + $0x20] sm:$0xff]  ;;  %v3314_v12 = vld [vmem:[#allocation2 + $0x248] sm:$0xff]  }
  0x2b   :  { %4114 = vmatprep.subr.bf16.mxu1 %v3271_v27  ;;  %v3296_v5 = vld [vmem:[#allocation2 + $0x1b8] sm:$0xff]   ;;  %v3305_v10 = vld [vmem:[#allocation2 + $0x200] sm:$0xff]   ;;  %v3330_v13 = vld [vmem:[#allocation2 + $0x2c8] sm:$0xff]  }
  0x2c   :  { %4084 = vmatpush3.bf16.msra.mxu0 %v3247_v28  ;;  %v3321_v11 = vld [vmem:[#allocation2 + $0x280] sm:$0xff]   ;;  %v37_v14 = vld [vmem:[%s4733_s0 + $0x48] sm:$0xff]  ;;  %v39_v15 = vld [vmem:[%s4733_s0 + $0x58] sm:$0xff] }
  0x2d   :  { %4086 = vmatprep.subr.bf16.mxu0 %v3256_v30  ;;  %v3306_v16 = vld [vmem:[#allocation2 + $0x208] sm:$0xff]   ;;  %v3315_v18 = vld [vmem:[#allocation2 + $0x250] sm:$0xff]   ;;  %v3316_v22 = vld [vmem:[#allocation2 + $0x258] sm:$0xff]  }
  0x2e   :  { %4116 = vmatpush3.bf16.msra.mxu1 %v3263_v29  ;;  %v3322_v17 = vld [vmem:[#allocation2 + $0x288] sm:$0xff]   ;;  %v3331_v19 = vld [vmem:[#allocation2 + $0x2d0] sm:$0xff]   ;;  %v3332_v23 = vld [vmem:[#allocation2 + $0x2d8] sm:$0xff]  }
  0x2f   :  { %4118 = vmatprep.subr.bf16.mxu1 %v3272_v31  ;;  %v3307_v20 = vld [vmem:[#allocation2 + $0x210] sm:$0xff]   ;;  %v3308_v24 = vld [vmem:[#allocation2 + $0x218] sm:$0xff]   ;;  %v3317_v26 = vld [vmem:[#allocation2 + $0x260] sm:$0xff]  }
  0x30   :  { %4088 = vmatpush3.bf16.msra.mxu0 %v3248_v32  ;;  %v3323_v21 = vld [vmem:[#allocation2 + $0x290] sm:$0xff]   ;;  %v3324_v25 = vld [vmem:[#allocation2 + $0x298] sm:$0xff]   ;;  %v3333_v27 = vld [vmem:[#allocation2 + $0x2e0] sm:$0xff]  }
  0x31   :  { %4122 = vmatprep.subr.bf16.mxu0 %v3281_v34  ;;  %v3309_v28 = vld [vmem:[#allocation2 + $0x220] sm:$0xff]   ;;  %v3318_v30 = vld [vmem:[#allocation2 + $0x268] sm:$0xff]   ;;  %v3319_v34 = vld [vmem:[#allocation2 + $0x270] sm:$0xff]  }
  0x32   :  { %4120 = vmatpush3.bf16.msra.mxu1 %v3264_v33  ;;  %v3325_v29 = vld [vmem:[#allocation2 + $0x2a0] sm:$0xff]   ;;  %v3334_v31 = vld [vmem:[#allocation2 + $0x2e8] sm:$0xff]  }
  0x33   :  { %4154 = vmatprep.subr.bf16.mxu1 %v3297_v35  ;;  %1156 = vmatmul.mubr.f32.vlgmr.msra.gmra.mrb[0].mxu0 %v28_v36  ;;  %v3310_v32 = vld [vmem:[#allocation2 + $0x228] sm:$0xff]   ;;  %v3335_v35 = vld [vmem:[#allocation2 + $0x2f0] sm:$0xff]  }
  0x34   :  { %4124 = vmatpush3.bf16.msra.mxu0 %v3273_v38  ;;  %1295 = vmatprep.mubr.f32.mxu0 %v33_v42  ;;  %v3326_v33 = vld [vmem:[#allocation2 + $0x2a8] sm:$0xff]   ;;  %v3311_v36 = vld [vmem:[#allocation2 + $0x230] sm:$0xff]   ;;  %v3320_v38 = vld [vmem:[#allocation2 + $0x278] sm:$0xff]  }
  0x35   :  { %1226 = vmatmul.mubr.f32.vlgmr.msra.gmra.mrb[0].mxu1 %v30_v37  ;;  %4126 = vmatprep.subr.bf16.mxu0 %v3282_v40  ;;  %v3327_v37 = vld [vmem:[#allocation2 + $0x2b0] sm:$0xff]   ;;  %v3312_v40 = vld [vmem:[#allocation2 + $0x238] sm:$0xff]   ;;  %v3345_v42 = vld [vmem:[#allocation2 + $0x340] sm:$0xff]  }
  0x36   :  { %4156 = vmatpush3.bf16.msra.mxu1 %v3289_v39  ;;  %1365 = vmatprep.mubr.f32.mxu1 %v35_v43  ;;  %v3336_v39 = vld [vmem:[#allocation2 + $0x2f8] sm:$0xff]   ;;  %v3361_v43 = vld [vmem:[#allocation2 + $0x3c0] sm:$0xff]  }
  0x37   :  { %4158 = vmatprep.subr.bf16.mxu1 %v3298_v41  ;;  %v3328_v41 = vld [vmem:[#allocation2 + $0x2b8] sm:$0xff]  }
  0x38   :  { %4128 = vmatpush3.bf16.msra.mxu0 %v3274_v44  ;;  %v36_v44 = vld [vmem:[%s4733_s0 + $0x40] sm:$0xff] }
  0x39   :  { %4130 = vmatprep.subr.bf16.mxu0 %v3283_v46  ;;  %v3337_v46 = vld [vmem:[#allocation2 + $0x300] sm:$0xff]  }
  0x3a   :  { %4160 = vmatpush3.bf16.msra.mxu1 %v3290_v45  ;;  %v38_v45 = vld [vmem:[%s4733_s0 + $0x50] sm:$0xff] }
  0x3b   :  { %4162 = vmatprep.subr.bf16.mxu1 %v3299_v47  ;;  %v3353_v47 = vld [vmem:[#allocation2 + $0x380] sm:$0xff]  }
  0x3c   :  { %4132 = vmatpush3.bf16.msra.mxu0 %v3275_v48  ;;  %v3346_v48 = vld [vmem:[#allocation2 + $0x348] sm:$0xff]  }
  0x3d   :  { %4134 = vmatprep.subr.bf16.mxu0 %v3284_v50  ;;  %v41_v50 = vld [vmem:[%s4733_s0 + $0x68] sm:$0xff] }
  0x3e   :  { %4164 = vmatpush3.bf16.msra.mxu1 %v3291_v49  ;;  %v3362_v49 = vld [vmem:[#allocation2 + $0x3c8] sm:$0xff]  }
  0x3f   :  { %4166 = vmatprep.subr.bf16.mxu1 %v3300_v51  ;;  %v43_v51 = vld [vmem:[%s4733_s0 + $0x78] sm:$0xff] }
  0x40   :  { %4136 = vmatpush3.bf16.msra.mxu0 %v3276_v52  ;;  %v3338_v52 = vld [vmem:[#allocation2 + $0x308] sm:$0xff]  }
  0x41   :  { %4138 = vmatprep.subr.bf16.mxu0 %v3285_v54  ;;  %v3347_v54 = vld [vmem:[#allocation2 + $0x350] sm:$0xff]  }
  0x42   :  { %4168 = vmatpush3.bf16.msra.mxu1 %v3292_v53  ;;  %v3354_v53 = vld [vmem:[#allocation2 + $0x388] sm:$0xff]  }
  0x43   :  { %4170 = vmatprep.subr.bf16.mxu1 %v3301_v55  ;;  %v3363_v55 = vld [vmem:[#allocation2 + $0x3d0] sm:$0xff]  }
  0x44   :  { %4140 = vmatpush3.bf16.msra.mxu0 %v3277_v56  ;;  %v3339_v56 = vld [vmem:[#allocation2 + $0x310] sm:$0xff]  }
  0x45   :  { %4142 = vmatprep.subr.bf16.mxu0 %v3286_v58  ;;  %v3348_v58 = vld [vmem:[#allocation2 + $0x358] sm:$0xff]  }
  0x46   :  { %4172 = vmatpush3.bf16.msra.mxu1 %v3293_v57  ;;  %v3355_v57 = vld [vmem:[#allocation2 + $0x390] sm:$0xff]  }
  0x47   :  { %4174 = vmatprep.subr.bf16.mxu1 %v3302_v59  ;;  %v3364_v59 = vld [vmem:[#allocation2 + $0x3d8] sm:$0xff]  }
  0x48   :  { %4144 = vmatpush3.bf16.msra.mxu0 %v3278_v60  ;;  %v3340_v60 = vld [vmem:[#allocation2 + $0x318] sm:$0xff]  }
  0x49   :  { %4146 = vmatprep.subr.bf16.mxu0 %v3287_v62  ;;  %v3349_v62 = vld [vmem:[#allocation2 + $0x360] sm:$0xff]  }
  0x4a   :  { %4176 = vmatpush3.bf16.msra.mxu1 %v3294_v61  ;;  %v3356_v61 = vld [vmem:[#allocation2 + $0x398] sm:$0xff]  }
  0x4b   :  { %4178 = vmatprep.subr.bf16.mxu1 %v3303_v63  ;;  %v3365_v63 = vld [vmem:[#allocation2 + $0x3e0] sm:$0xff]  }
  0x4c   :  { %4148 = vmatpush3.bf16.msra.mxu0 %v3279_v0  ;;  %v3341_v0 = vld [vmem:[#allocation2 + $0x320] sm:$0xff]  }
  0x4d   :  { %4150 = vmatprep.subr.bf16.mxu0 %v3288_v2  ;;  %v3350_v2 = vld [vmem:[#allocation2 + $0x368] sm:$0xff]  }
  0x4e   :  { %4180 = vmatpush3.bf16.msra.mxu1 %v3295_v1  ;;  %v3357_v1 = vld [vmem:[#allocation2 + $0x3a0] sm:$0xff]  }
  0x4f   :  { %4182 = vmatprep.subr.bf16.mxu1 %v3304_v3  ;;  %v3366_v3 = vld [vmem:[#allocation2 + $0x3e8] sm:$0xff]  }
  0x50   :  { %4152 = vmatpush3.bf16.msra.mxu0 %v3280_v4  ;;  %v3342_v4 = vld [vmem:[#allocation2 + $0x328] sm:$0xff]  }
  0x51   :  { %4186 = vmatprep.subr.bf16.mxu0 %v3313_v6  ;;  %v3351_v6 = vld [vmem:[#allocation2 + $0x370] sm:$0xff]  }
  0x52   :  { %4184 = vmatpush3.bf16.msra.mxu1 %v3296_v5  ;;  %v3358_v5 = vld [vmem:[#allocation2 + $0x3a8] sm:$0xff]  }
  0x53   :  { %4218 = vmatprep.subr.bf16.mxu1 %v3329_v7  ;;  %1296 = vmatmul.mubr.f32.vlgmr.msra.gmra.mrb[2].mxu0 %v32_v8  ;;  %v3367_v7 = vld [vmem:[#allocation2 + $0x3f0] sm:$0xff]  }
  0x54   :  { %4188 = vmatpush3.bf16.msra.mxu0 %v3305_v10  ;;  %1435 = vmatprep.mubr.f32.mxu0 %v37_v14  ;;  %v3343_v8 = vld [vmem:[#allocation2 + $0x330] sm:$0xff]   ;;  %v3352_v10 = vld [vmem:[#allocation2 + $0x378] sm:$0xff]   ;;  %v3377_v14 = vld [vmem:[#allocation2 + $0x440] sm:$0xff]  }
  0x55   :  { %1366 = vmatmul.mubr.f32.vlgmr.msra.gmra.mrb[2].mxu1 %v34_v9  ;;  %4190 = vmatprep.subr.bf16.mxu0 %v3314_v12  ;;  %v3359_v9 = vld [vmem:[#allocation2 + $0x3b0] sm:$0xff]   ;;  %v3344_v12 = vld [vmem:[#allocation2 + $0x338] sm:$0xff]  }
  0x56   :  { %4220 = vmatpush3.bf16.msra.mxu1 %v3321_v11  ;;  %1505 = vmatprep.mubr.f32.mxu1 %v39_v15  ;;  %v3368_v11 = vld [vmem:[#allocation2 + $0x3f8] sm:$0xff]   ;;  %v3393_v15 = vld [vmem:[#allocation2 + $0x4c0] sm:$0xff]  }
  0x57   :  { %4222 = vmatprep.subr.bf16.mxu1 %v3330_v13  ;;  %v3360_v13 = vld [vmem:[#allocation2 + $0x3b8] sm:$0xff]  }
  0x58   :  { %4192 = vmatpush3.bf16.msra.mxu0 %v3306_v16  ;;  %v40_v16 = vld [vmem:[%s4733_s0 + $0x60] sm:$0xff] }
  0x59   :  { %4194 = vmatprep.subr.bf16.mxu0 %v3315_v18  ;;  %v3369_v18 = vld [vmem:[#allocation2 + $0x400] sm:$0xff]  }
  0x5a   :  { %4224 = vmatpush3.bf16.msra.mxu1 %v3322_v17  ;;  %v42_v17 = vld [vmem:[%s4733_s0 + $0x70] sm:$0xff] }
  0x5b   :  { %4226 = vmatprep.subr.bf16.mxu1 %v3331_v19  ;;  %v3385_v19 = vld [vmem:[#allocation2 + $0x480] sm:$0xff]  }
  0x5c   :  { %4196 = vmatpush3.bf16.msra.mxu0 %v3307_v20  ;;  %v3378_v20 = vld [vmem:[#allocation2 + $0x448] sm:$0xff]  }
  0x5d   :  { %4198 = vmatprep.subr.bf16.mxu0 %v3316_v22  ;;  %v45_v22 = vld [vmem:[%s4733_s0 + $0x88] sm:$0xff] }
  0x5e   :  { %4228 = vmatpush3.bf16.msra.mxu1 %v3323_v21  ;;  %v3394_v21 = vld [vmem:[#allocation2 + $0x4c8] sm:$0xff]  }
  0x5f   :  { %4230 = vmatprep.subr.bf16.mxu1 %v3332_v23  ;;  %v47_v23 = vld [vmem:[%s4733_s0 + $0x98] sm:$0xff] }
  0x60   :  { %4200 = vmatpush3.bf16.msra.mxu0 %v3308_v24  ;;  %v3370_v24 = vld [vmem:[#allocation2 + $0x408] sm:$0xff]  }
  0x61   :  { %4202 = vmatprep.subr.bf16.mxu0 %v3317_v26  ;;  %v3379_v26 = vld [vmem:[#allocation2 + $0x450] sm:$0xff]  }
  0x62   :  { %4232 = vmatpush3.bf16.msra.mxu1 %v3324_v25  ;;  %v3386_v25 = vld [vmem:[#allocation2 + $0x488] sm:$0xff]  }
  0x63   :  { %4234 = vmatprep.subr.bf16.mxu1 %v3333_v27  ;;  %v3395_v27 = vld [vmem:[#allocation2 + $0x4d0] sm:$0xff]  }
  0x64   :  { %4204 = vmatpush3.bf16.msra.mxu0 %v3309_v28  ;;  %v3371_v28 = vld [vmem:[#allocation2 + $0x410] sm:$0xff]  }
  0x65   :  { %4206 = vmatprep.subr.bf16.mxu0 %v3318_v30  ;;  %v3380_v30 = vld [vmem:[#allocation2 + $0x458] sm:$0xff]  }
  0x66   :  { %4236 = vmatpush3.bf16.msra.mxu1 %v3325_v29  ;;  %v3387_v29 = vld [vmem:[#allocation2 + $0x490] sm:$0xff]  }
  0x67   :  { %4238 = vmatprep.subr.bf16.mxu1 %v3334_v31  ;;  %v3396_v31 = vld [vmem:[#allocation2 + $0x4d8] sm:$0xff]  }
  0x68   :  { %4208 = vmatpush3.bf16.msra.mxu0 %v3310_v32  ;;  %v3372_v32 = vld [vmem:[#allocation2 + $0x418] sm:$0xff]  }
  0x69   :  { %4210 = vmatprep.subr.bf16.mxu0 %v3319_v34  ;;  %v3381_v34 = vld [vmem:[#allocation2 + $0x460] sm:$0xff]  }
  0x6a   :  { %4240 = vmatpush3.bf16.msra.mxu1 %v3326_v33  ;;  %v3388_v33 = vld [vmem:[#allocation2 + $0x498] sm:$0xff]  }
  0x6b   :  { %4242 = vmatprep.subr.bf16.mxu1 %v3335_v35  ;;  %v3397_v35 = vld [vmem:[#allocation2 + $0x4e0] sm:$0xff]  }
  0x6c   :  { %4212 = vmatpush3.bf16.msra.mxu0 %v3311_v36  ;;  %v3373_v36 = vld [vmem:[#allocation2 + $0x420] sm:$0xff]  }
  0x6d   :  { %4214 = vmatprep.subr.bf16.mxu0 %v3320_v38  ;;  %v3382_v38 = vld [vmem:[#allocation2 + $0x468] sm:$0xff]  }
  0x6e   :  { %4244 = vmatpush3.bf16.msra.mxu1 %v3327_v37  ;;  %v3389_v37 = vld [vmem:[#allocation2 + $0x4a0] sm:$0xff]  }
  0x6f   :  { %4246 = vmatprep.subr.bf16.mxu1 %v3336_v39  ;;  %v3398_v39 = vld [vmem:[#allocation2 + $0x4e8] sm:$0xff]  }
  0x70   :  { %4216 = vmatpush3.bf16.msra.mxu0 %v3312_v40  ;;  %v3374_v40 = vld [vmem:[#allocation2 + $0x428] sm:$0xff]  }
  0x71   :  { %4250 = vmatprep.subr.bf16.mxu0 %v3345_v42  ;;  %v3383_v42 = vld [vmem:[#allocation2 + $0x470] sm:$0xff]  }
  0x72   :  { %4248 = vmatpush3.bf16.msra.mxu1 %v3328_v41  ;;  %v3390_v41 = vld [vmem:[#allocation2 + $0x4a8] sm:$0xff]  }
  0x73   :  { %4282 = vmatprep.subr.bf16.mxu1 %v3361_v43  ;;  %1436 = vmatmul.mubr.f32.vlgmr.msra.gmra.mrb[4].mxu0 %v36_v44  ;;  %v3399_v43 = vld [vmem:[#allocation2 + $0x4f0] sm:$0xff]  }
  0x74   :  { %4252 = vmatpush3.bf16.msra.mxu0 %v3337_v46  ;;  %1575 = vmatprep.mubr.f32.mxu0 %v41_v50  ;;  %v3375_v44 = vld [vmem:[#allocation2 + $0x430] sm:$0xff]   ;;  %v3384_v46 = vld [vmem:[#allocation2 + $0x478] sm:$0xff]   ;;  %v3409_v50 = vld [vmem:[#allocation2 + $0x540] sm:$0xff]  }
  0x75   :  { %1506 = vmatmul.mubr.f32.vlgmr.msra.gmra.mrb[4].mxu1 %v38_v45  ;;  %4254 = vmatprep.subr.bf16.mxu0 %v3346_v48  ;;  %v3391_v45 = vld [vmem:[#allocation2 + $0x4b0] sm:$0xff]   ;;  %v3376_v48 = vld [vmem:[#allocation2 + $0x438] sm:$0xff]  }
  0x76   :  { %4284 = vmatpush3.bf16.msra.mxu1 %v3353_v47  ;;  %1645 = vmatprep.mubr.f32.mxu1 %v43_v51  ;;  %v3400_v47 = vld [vmem:[#allocation2 + $0x4f8] sm:$0xff]   ;;  %v3425_v51 = vld [vmem:[#allocation2 + $0x5c0] sm:$0xff]  }
  0x77   :  { %4286 = vmatprep.subr.bf16.mxu1 %v3362_v49  ;;  %v3392_v49 = vld [vmem:[#allocation2 + $0x4b8] sm:$0xff]  }
  0x78   :  { %4256 = vmatpush3.bf16.msra.mxu0 %v3338_v52  ;;  %v44_v52 = vld [vmem:[%s4733_s0 + $0x80] sm:$0xff] }
  0x79   :  { %4258 = vmatprep.subr.bf16.mxu0 %v3347_v54  ;;  %v3401_v54 = vld [vmem:[#allocation2 + $0x500] sm:$0xff]  }
  0x7a   :  { %4288 = vmatpush3.bf16.msra.mxu1 %v3354_v53  ;;  %v46_v53 = vld [vmem:[%s4733_s0 + $0x90] sm:$0xff] }
  0x7b   :  { %4290 = vmatprep.subr.bf16.mxu1 %v3363_v55  ;;  %v3417_v55 = vld [vmem:[#allocation2 + $0x580] sm:$0xff]  }
  0x7c   :  { %4260 = vmatpush3.bf16.msra.mxu0 %v3339_v56  ;;  %v3410_v56 = vld [vmem:[#allocation2 + $0x548] sm:$0xff]  }
  0x7d   :  { %4262 = vmatprep.subr.bf16.mxu0 %v3348_v58  ;;  %v49_v58 = vld [vmem:[%s4733_s0 + $0xa8] sm:$0xff] }
  0x7e   :  { %4292 = vmatpush3.bf16.msra.mxu1 %v3355_v57  ;;  %v3426_v57 = vld [vmem:[#allocation2 + $0x5c8] sm:$0xff]  }
  0x7f   :  { %4294 = vmatprep.subr.bf16.mxu1 %v3364_v59  ;;  %v51_v59 = vld [vmem:[%s4733_s0 + $0xb8] sm:$0xff] }
  0x80   :  { %4264 = vmatpush3.bf16.msra.mxu0 %v3340_v60  ;;  %v3402_v60 = vld [vmem:[#allocation2 + $0x508] sm:$0xff]  }
  0x81   :  { %4266 = vmatprep.subr.bf16.mxu0 %v3349_v62  ;;  %v3411_v62 = vld [vmem:[#allocation2 + $0x550] sm:$0xff]  }
  0x82   :  { %4296 = vmatpush3.bf16.msra.mxu1 %v3356_v61  ;;  %v3418_v61 = vld [vmem:[#allocation2 + $0x588] sm:$0xff]  }
  0x83   :  { %4298 = vmatprep.subr.bf16.mxu1 %v3365_v63  ;;  %v3427_v63 = vld [vmem:[#allocation2 + $0x5d0] sm:$0xff]  }
  0x84   :  { %4268 = vmatpush3.bf16.msra.mxu0 %v3341_v0  ;;  %v3403_v0 = vld [vmem:[#allocation2 + $0x510] sm:$0xff]  }
  0x85   :  { %4270 = vmatprep.subr.bf16.mxu0 %v3350_v2  ;;  %v3412_v2 = vld [vmem:[#allocation2 + $0x558] sm:$0xff]  }
  0x86   :  { %4300 = vmatpush3.bf16.msra.mxu1 %v3357_v1  ;;  %v3419_v1 = vld [vmem:[#allocation2 + $0x590] sm:$0xff]  }
  0x87   :  { %4302 = vmatprep.subr.bf16.mxu1 %v3366_v3  ;;  %v3428_v3 = vld [vmem:[#allocation2 + $0x5d8] sm:$0xff]  }
  0x88   :  { %4272 = vmatpush3.bf16.msra.mxu0 %v3342_v4  ;;  %v3404_v4 = vld [vmem:[#allocation2 + $0x518] sm:$0xff]  }
  0x89   :  { %4274 = vmatprep.subr.bf16.mxu0 %v3351_v6  ;;  %v3413_v6 = vld [vmem:[#allocation2 + $0x560] sm:$0xff]  }
  0x8a   :  { %4304 = vmatpush3.bf16.msra.mxu1 %v3358_v5  ;;  %v3420_v5 = vld [vmem:[#allocation2 + $0x598] sm:$0xff]  }
  0x8b   :  { %4306 = vmatprep.subr.bf16.mxu1 %v3367_v7  ;;  %v3429_v7 = vld [vmem:[#allocation2 + $0x5e0] sm:$0xff]  }
  0x8c   :  { %4276 = vmatpush3.bf16.msra.mxu0 %v3343_v8  ;;  %v3405_v8 = vld [vmem:[#allocation2 + $0x520] sm:$0xff]  }
  0x8d   :  { %4278 = vmatprep.subr.bf16.mxu0 %v3352_v10  ;;  %v3414_v10 = vld [vmem:[#allocation2 + $0x568] sm:$0xff]  }
  0x8e   :  { %4308 = vmatpush3.bf16.msra.mxu1 %v3359_v9  ;;  %v3421_v9 = vld [vmem:[#allocation2 + $0x5a0] sm:$0xff]  }
  0x8f   :  { %4310 = vmatprep.subr.bf16.mxu1 %v3368_v11  ;;  %v3430_v11 = vld [vmem:[#allocation2 + $0x5e8] sm:$0xff]  }
  0x90   :  { %4280 = vmatpush3.bf16.msra.mxu0 %v3344_v12  ;;  %v3406_v12 = vld [vmem:[#allocation2 + $0x528] sm:$0xff]  }
  0x91   :  { %4314 = vmatprep.subr.bf16.mxu0 %v3377_v14  ;;  %v3415_v14 = vld [vmem:[#allocation2 + $0x570] sm:$0xff]  }
  0x92   :  { %4312 = vmatpush3.bf16.msra.mxu1 %v3360_v13  ;;  %v3422_v13 = vld [vmem:[#allocation2 + $0x5a8] sm:$0xff]  }
  0x93   :  { %4346 = vmatprep.subr.bf16.mxu1 %v3393_v15  ;;  %1576 = vmatmul.mubr.f32.vlgmr.msra.gmra.mrb[6].mxu0 %v40_v16  ;;  %v3431_v15 = vld [vmem:[#allocation2 + $0x5f0] sm:$0xff]  }
  0x94   :  { %4316 = vmatpush3.bf16.msra.mxu0 %v3369_v18  ;;  %1715 = vmatprep.mubr.f32.mxu0 %v45_v22  ;;  %v3407_v16 = vld [vmem:[#allocation2 + $0x530] sm:$0xff]   ;;  %v3416_v18 = vld [vmem:[#allocation2 + $0x578] sm:$0xff]   ;;  %v3441_v22 = vld [vmem:[#allocation2 + $0x640] sm:$0xff]  }
  0x95   :  { %1646 = vmatmul.mubr.f32.vlgmr.msra.gmra.mrb[6].mxu1 %v42_v17  ;;  %4318 = vmatprep.subr.bf16.mxu0 %v3378_v20  ;;  %v3423_v17 = vld [vmem:[#allocation2 + $0x5b0] sm:$0xff]   ;;  %v3408_v20 = vld [vmem:[#allocation2 + $0x538] sm:$0xff]  }
  0x96   :  { %4348 = vmatpush3.bf16.msra.mxu1 %v3385_v19  ;;  %1785 = vmatprep.mubr.f32.mxu1 %v47_v23  ;;  %v3432_v19 = vld [vmem:[#allocation2 + $0x5f8] sm:$0xff]   ;;  %v3457_v23 = vld [vmem:[#allocation2 + $0x6c0] sm:$0xff]  }
  0x97   :  { %4350 = vmatprep.subr.bf16.mxu1 %v3394_v21  ;;  %v3424_v21 = vld [vmem:[#allocation2 + $0x5b8] sm:$0xff]  }
  0x98   :  { %4320 = vmatpush3.bf16.msra.mxu0 %v3370_v24  ;;  %v48_v24 = vld [vmem:[%s4733_s0 + $0xa0] sm:$0xff] }
  0x99   :  { %4322 = vmatprep.subr.bf16.mxu0 %v3379_v26  ;;  %v3433_v26 = vld [vmem:[#allocation2 + $0x600] sm:$0xff]  }
  0x9a   :  { %4352 = vmatpush3.bf16.msra.mxu1 %v3386_v25  ;;  %v50_v25 = vld [vmem:[%s4733_s0 + $0xb0] sm:$0xff] }
  0x9b   :  { %4354 = vmatprep.subr.bf16.mxu1 %v3395_v27  ;;  %v3449_v27 = vld [vmem:[#allocation2 + $0x680] sm:$0xff]  }
  0x9c   :  { %4324 = vmatpush3.bf16.msra.mxu0 %v3371_v28  ;;  %v3442_v28 = vld [vmem:[#allocation2 + $0x648] sm:$0xff]  }
  0x9d   :  { %4326 = vmatprep.subr.bf16.mxu0 %v3380_v30  ;;  %v53_v30 = vld [vmem:[%s4733_s0 + $0xc8] sm:$0xff] }
  0x9e   :  { %4356 = vmatpush3.bf16.msra.mxu1 %v3387_v29  ;;  %v3458_v29 = vld [vmem:[#allocation2 + $0x6c8] sm:$0xff]  }
  0x9f   :  { %4358 = vmatprep.subr.bf16.mxu1 %v3396_v31  ;;  %v55_v31 = vld [vmem:[%s4733_s0 + $0xd8] sm:$0xff] }
  0xa0   :  { %4328 = vmatpush3.bf16.msra.mxu0 %v3372_v32  ;;  %v3434_v32 = vld [vmem:[#allocation2 + $0x608] sm:$0xff]  }
  0xa1   :  { %4330 = vmatprep.subr.bf16.mxu0 %v3381_v34  ;;  %v3443_v34 = vld [vmem:[#allocation2 + $0x650] sm:$0xff]  }
  0xa2   :  { %4360 = vmatpush3.bf16.msra.mxu1 %v3388_v33  ;;  %v3450_v33 = vld [vmem:[#allocation2 + $0x688] sm:$0xff]  }
  0xa3   :  { %4362 = vmatprep.subr.bf16.mxu1 %v3397_v35  ;;  %v3459_v35 = vld [vmem:[#allocation2 + $0x6d0] sm:$0xff]  }
  0xa4   :  { %4332 = vmatpush3.bf16.msra.mxu0 %v3373_v36  ;;  %v3435_v36 = vld [vmem:[#allocation2 + $0x610] sm:$0xff]  }
  0xa5   :  { %4334 = vmatprep.subr.bf16.mxu0 %v3382_v38  ;;  %v3444_v38 = vld [vmem:[#allocation2 + $0x658] sm:$0xff]  }
  0xa6   :  { %4364 = vmatpush3.bf16.msra.mxu1 %v3389_v37  ;;  %v3451_v37 = vld [vmem:[#allocation2 + $0x690] sm:$0xff]  }
  0xa7   :  { %4366 = vmatprep.subr.bf16.mxu1 %v3398_v39  ;;  %v3460_v39 = vld [vmem:[#allocation2 + $0x6d8] sm:$0xff]  }
  0xa8   :  { %4336 = vmatpush3.bf16.msra.mxu0 %v3374_v40  ;;  %v3436_v40 = vld [vmem:[#allocation2 + $0x618] sm:$0xff]  }
  0xa9   :  { %4338 = vmatprep.subr.bf16.mxu0 %v3383_v42  ;;  %v3445_v42 = vld [vmem:[#allocation2 + $0x660] sm:$0xff]  }
  0xaa   :  { %4368 = vmatpush3.bf16.msra.mxu1 %v3390_v41  ;;  %v3452_v41 = vld [vmem:[#allocation2 + $0x698] sm:$0xff]  }
  0xab   :  { %4370 = vmatprep.subr.bf16.mxu1 %v3399_v43  ;;  %v3461_v43 = vld [vmem:[#allocation2 + $0x6e0] sm:$0xff]  }
  0xac   :  { %4340 = vmatpush3.bf16.msra.mxu0 %v3375_v44  ;;  %v3437_v44 = vld [vmem:[#allocation2 + $0x620] sm:$0xff]  }
  0xad   :  { %4342 = vmatprep.subr.bf16.mxu0 %v3384_v46  ;;  %v3446_v46 = vld [vmem:[#allocation2 + $0x668] sm:$0xff]  }
  0xae   :  { %4372 = vmatpush3.bf16.msra.mxu1 %v3391_v45  ;;  %v3453_v45 = vld [vmem:[#allocation2 + $0x6a0] sm:$0xff]  }
  0xaf   :  { %4374 = vmatprep.subr.bf16.mxu1 %v3400_v47  ;;  %v3462_v47 = vld [vmem:[#allocation2 + $0x6e8] sm:$0xff]  }
  0xb0   :  { %4344 = vmatpush3.bf16.msra.mxu0 %v3376_v48  ;;  %v3438_v48 = vld [vmem:[#allocation2 + $0x628] sm:$0xff]  }
  0xb1   :  { %4378 = vmatprep.subr.bf16.mxu0 %v3409_v50  ;;  %v3447_v50 = vld [vmem:[#allocation2 + $0x670] sm:$0xff]  }
  0xb2   :  { %4376 = vmatpush3.bf16.msra.mxu1 %v3392_v49  ;;  %v3454_v49 = vld [vmem:[#allocation2 + $0x6a8] sm:$0xff]  }
  0xb3   :  { %4410 = vmatprep.subr.bf16.mxu1 %v3425_v51  ;;  %1716 = vmatmul.mubr.f32.vlgmr.msra.gmra.mrb[8].mxu0 %v44_v52  ;;  %v3463_v51 = vld [vmem:[#allocation2 + $0x6f0] sm:$0xff]  }
  0xb4   :  { %4380 = vmatpush3.bf16.msra.mxu0 %v3401_v54  ;;  %1855 = vmatprep.mubr.f32.mxu0 %v49_v58  ;;  %v3439_v52 = vld [vmem:[#allocation2 + $0x630] sm:$0xff]   ;;  %v3448_v54 = vld [vmem:[#allocation2 + $0x678] sm:$0xff]   ;;  %v3473_v58 = vld [vmem:[#allocation2 + $0x740] sm:$0xff]  }
  0xb5   :  { %1786 = vmatmul.mubr.f32.vlgmr.msra.gmra.mrb[8].mxu1 %v46_v53  ;;  %4382 = vmatprep.subr.bf16.mxu0 %v3410_v56  ;;  %v3455_v53 = vld [vmem:[#allocation2 + $0x6b0] sm:$0xff]   ;;  %v3440_v56 = vld [vmem:[#allocation2 + $0x638] sm:$0xff]  }
  0xb6   :  { %4412 = vmatpush3.bf16.msra.mxu1 %v3417_v55  ;;  %1925 = vmatprep.mubr.f32.mxu1 %v51_v59  ;;  %v3464_v55 = vld [vmem:[#allocation2 + $0x6f8] sm:$0xff]   ;;  %v3489_v59 = vld [vmem:[#allocation2 + $0x7c0] sm:$0xff]  }
  0xb7   :  { %4414 = vmatprep.subr.bf16.mxu1 %v3426_v57  ;;  %v3456_v57 = vld [vmem:[#allocation2 + $0x6b8] sm:$0xff]  }
  0xb8   :  { %4384 = vmatpush3.bf16.msra.mxu0 %v3402_v60  ;;  %v52_v60 = vld [vmem:[%s4733_s0 + $0xc0] sm:$0xff] }
  0xb9   :  { %4386 = vmatprep.subr.bf16.mxu0 %v3411_v62  ;;  %v3465_v62 = vld [vmem:[#allocation2 + $0x700] sm:$0xff]  }
  0xba   :  { %4416 = vmatpush3.bf16.msra.mxu1 %v3418_v61  ;;  %v54_v61 = vld [vmem:[%s4733_s0 + $0xd0] sm:$0xff] }
  0xbb   :  { %4418 = vmatprep.subr.bf16.mxu1 %v3427_v63  ;;  %v3481_v63 = vld [vmem:[#allocation2 + $0x780] sm:$0xff]  }
  0xbc   :  { %4388 = vmatpush3.bf16.msra.mxu0 %v3403_v0  ;;  %v3474_v0 = vld [vmem:[#allocation2 + $0x748] sm:$0xff]  }
  0xbd   :  { %4390 = vmatprep.subr.bf16.mxu0 %v3412_v2  ;;  %v57_v2 = vld [vmem:[%s4733_s0 + $0xe8] sm:$0xff] }
  0xbe   :  { %4420 = vmatpush3.bf16.msra.mxu1 %v3419_v1  ;;  %v3490_v1 = vld [vmem:[#allocation2 + $0x7c8] sm:$0xff]  }
  0xbf   :  { %4422 = vmatprep.subr.bf16.mxu1 %v3428_v3  ;;  %v59_v3 = vld [vmem:[%s4733_s0 + $0xf8] sm:$0xff] }
  0xc0   :  { %4392 = vmatpush3.bf16.msra.mxu0 %v3404_v4  ;;  %v3466_v4 = vld [vmem:[#allocation2 + $0x708] sm:$0xff]  }
  0xc1   :  { %4394 = vmatprep.subr.bf16.mxu0 %v3413_v6  ;;  %v3475_v6 = vld [vmem:[#allocation2 + $0x750] sm:$0xff]  }
  0xc2   :  { %4424 = vmatpush3.bf16.msra.mxu1 %v3420_v5  ;;  %v3482_v5 = vld [vmem:[#allocation2 + $0x788] sm:$0xff]  }
  0xc3   :  { %4426 = vmatprep.subr.bf16.mxu1 %v3429_v7  ;;  %v3491_v7 = vld [vmem:[#allocation2 + $0x7d0] sm:$0xff]  }
  0xc4   :  { %4396 = vmatpush3.bf16.msra.mxu0 %v3405_v8  ;;  %v3467_v8 = vld [vmem:[#allocation2 + $0x710] sm:$0xff]  }
  0xc5   :  { %4398 = vmatprep.subr.bf16.mxu0 %v3414_v10  ;;  %v3476_v10 = vld [vmem:[#allocation2 + $0x758] sm:$0xff]  }
  0xc6   :  { %4428 = vmatpush3.bf16.msra.mxu1 %v3421_v9  ;;  %v3483_v9 = vld [vmem:[#allocation2 + $0x790] sm:$0xff]  }
  0xc7   :  { %4430 = vmatprep.subr.bf16.mxu1 %v3430_v11  ;;  %v3492_v11 = vld [vmem:[#allocation2 + $0x7d8] sm:$0xff]  }
  0xc8   :  { %4400 = vmatpush3.bf16.msra.mxu0 %v3406_v12  ;;  %v3468_v12 = vld [vmem:[#allocation2 + $0x718] sm:$0xff]  }
  0xc9   :  { %4402 = vmatprep.subr.bf16.mxu0 %v3415_v14  ;;  %v3477_v14 = vld [vmem:[#allocation2 + $0x760] sm:$0xff]  }
  0xca   :  { %4432 = vmatpush3.bf16.msra.mxu1 %v3422_v13  ;;  %v3484_v13 = vld [vmem:[#allocation2 + $0x798] sm:$0xff]  }
  0xcb   :  { %4434 = vmatprep.subr.bf16.mxu1 %v3431_v15  ;;  %v3493_v15 = vld [vmem:[#allocation2 + $0x7e0] sm:$0xff]  }
  0xcc   :  { %4404 = vmatpush3.bf16.msra.mxu0 %v3407_v16  ;;  %v3469_v16 = vld [vmem:[#allocation2 + $0x720] sm:$0xff]  }
  0xcd   :  { %4406 = vmatprep.subr.bf16.mxu0 %v3416_v18  ;;  %v3478_v18 = vld [vmem:[#allocation2 + $0x768] sm:$0xff]  }
  0xce   :  { %4436 = vmatpush3.bf16.msra.mxu1 %v3423_v17  ;;  %v3485_v17 = vld [vmem:[#allocation2 + $0x7a0] sm:$0xff]  }
  0xcf   :  { %4438 = vmatprep.subr.bf16.mxu1 %v3432_v19  ;;  %v3494_v19 = vld [vmem:[#allocation2 + $0x7e8] sm:$0xff]  }
  0xd0   :  { %4408 = vmatpush3.bf16.msra.mxu0 %v3408_v20  ;;  %v3470_v20 = vld [vmem:[#allocation2 + $0x728] sm:$0xff]  }
  0xd1   :  { %4442 = vmatprep.subr.bf16.mxu0 %v3441_v22 }
  0xd2   :  { %4440 = vmatpush3.bf16.msra.mxu1 %v3424_v21  ;;  %v3486_v21 = vld [vmem:[#allocation2 + $0x7a8] sm:$0xff]  }
  0xd3   :  { %4474 = vmatprep.subr.bf16.mxu1 %v3457_v23  ;;  %1856 = vmatmul.mubr.f32.vlgmr.msra.gmra.mrb[10].mxu0 %v48_v24  ;;  %v3479_v24 = vld [vmem:[#allocation2 + $0x770] sm:$0xff]  }
  0xd4   :  { %4444 = vmatpush3.bf16.msra.mxu0 %v3433_v26  ;;  %1995 = vmatprep.mubr.f32.mxu0 %v53_v30  ;;  %v2217_v26 = vld [vmem:[%s4735_s2] ss:$0 sm:$0xff] }
  0xd5   :  { %1926 = vmatmul.mubr.f32.vlgmr.msra.gmra.mrb[10].mxu1 %v50_v25  ;;  %4446 = vmatprep.subr.bf16.mxu0 %v3442_v28  ;;  %v3495_v25 = vld [vmem:[#allocation2 + $0x7f0] sm:$0xff]  }
  0xd6   :  { %4476 = vmatpush3.bf16.msra.mxu1 %v3449_v27  ;;  %2065 = vmatprep.mubr.f32.mxu1 %v55_v31  ;;  %v3471_v31 = vld [vmem:[#allocation2 + $0x730] sm:$0xff]  }
  0xd7   :  { %4478 = vmatprep.subr.bf16.mxu1 %v3458_v29 }
  0xd8   :  { %4448 = vmatpush3.bf16.msra.mxu0 %v3434_v32  ;;  %v3487_v32 = vld [vmem:[#allocation2 + $0x7b0] sm:$0xff]  }
  0xd9   :  { %4450 = vmatprep.subr.bf16.mxu0 %v3443_v34  ;;  %v3480_v34 = vld [vmem:[#allocation2 + $0x778] sm:$0xff]  }
  0xda   :  { %4480 = vmatpush3.bf16.msra.mxu1 %v3450_v33 }
  0xdb   :  { %4482 = vmatprep.subr.bf16.mxu1 %v3459_v35  ;;  %v3496_v35 = vld [vmem:[#allocation2 + $0x7f8] sm:$0xff]  }
  0xdc   :  { %4452 = vmatpush3.bf16.msra.mxu0 %v3435_v36 }
  0xdd   :  { %4454 = vmatprep.subr.bf16.mxu0 %v3444_v38  ;;  %v3488_v38 = vld [vmem:[#allocation2 + $0x7b8] sm:$0xff]  }
  0xde   :  { %4484 = vmatpush3.bf16.msra.mxu1 %v3451_v37  ;;  %v3472_v37 = vld [vmem:[#allocation2 + $0x738] sm:$0xff]  }
  0xdf   :  { %4486 = vmatprep.subr.bf16.mxu1 %v3460_v39  ;;  %v56_v39 = vld [vmem:[%s4733_s0 + $0xe0] sm:$0xff] }
  0xe0   :  { %4456 = vmatpush3.bf16.msra.mxu0 %v3436_v40  ;;  %v58_v40 = vld [vmem:[%s4733_s0 + $0xf0] sm:$0xff] }
  0xe1   :  { %4458 = vmatprep.subr.bf16.mxu0 %v3445_v42 }
  0xe2   :  { %4488 = vmatpush3.bf16.msra.mxu1 %v3452_v41 }
  0xe3   :  { %4490 = vmatprep.subr.bf16.mxu1 %v3461_v43 }
  0xe4   :  { %4460 = vmatpush3.bf16.msra.mxu0 %v3437_v44 }
  0xe5   :  { %4462 = vmatprep.subr.bf16.mxu0 %v3446_v46 }
  0xe6   :  { %4492 = vmatpush3.bf16.msra.mxu1 %v3453_v45 }
  0xe7   :  { %4494 = vmatprep.subr.bf16.mxu1 %v3462_v47 }
  0xe8   :  { %4464 = vmatpush3.bf16.msra.mxu0 %v3438_v48 }
  0xe9   :  { %4466 = vmatprep.subr.bf16.mxu0 %v3447_v50 }
  0xea   :  { %4496 = vmatpush3.bf16.msra.mxu1 %v3454_v49 }
  0xeb   :  { %4498 = vmatprep.subr.bf16.mxu1 %v3463_v51 }
  0xec   :  { %4468 = vmatpush3.bf16.msra.mxu0 %v3439_v52 }
  0xed   :  { %4470 = vmatprep.subr.bf16.mxu0 %v3448_v54 }
  0xee   :  { %4500 = vmatpush3.bf16.msra.mxu1 %v3455_v53 }
  0xef   :  { %4502 = vmatprep.subr.bf16.mxu1 %v3464_v55 }
  0xf0   :  { %4472 = vmatpush3.bf16.msra.mxu0 %v3440_v56 }
  0xf1   :  { %4506 = vmatprep.subr.bf16.mxu0 %v3473_v58 }
  0xf2   :  { %4504 = vmatpush3.bf16.msra.mxu1 %v3456_v57 }
  0xf3   :  { %4538 = vmatprep.subr.bf16.mxu1 %v3489_v59  ;;  %1996 = vmatmul.mubr.f32.vlgmr.msra.gmra.mrb[12].mxu0 %v52_v60 }
  0xf4   :  { %4508 = vmatpush3.bf16.msra.mxu0 %v3465_v62  ;;  %2135 = vmatprep.mubr.f32.mxu0 %v57_v2 }
  0xf5   :  { %2066 = vmatmul.mubr.f32.vlgmr.msra.gmra.mrb[12].mxu1 %v54_v61  ;;  %4510 = vmatprep.subr.bf16.mxu0 %v3474_v0 }
  0xf6   :  { %4540 = vmatpush3.bf16.msra.mxu1 %v3481_v63  ;;  %2205 = vmatprep.mubr.f32.mxu1 %v59_v3 }
  0xf7   :  { %4542 = vmatprep.subr.bf16.mxu1 %v3490_v1 }
  0xf8   :  { %4512 = vmatpush3.bf16.msra.mxu0 %v3466_v4 }
  0xf9   :  { %4514 = vmatprep.subr.bf16.mxu0 %v3475_v6 }
  0xfa   :  { %4544 = vmatpush3.bf16.msra.mxu1 %v3482_v5 }
  0xfb   :  { %4546 = vmatprep.subr.bf16.mxu1 %v3491_v7 }
  0xfc   :  { %4516 = vmatpush3.bf16.msra.mxu0 %v3467_v8 }
  0xfd   :  { %4518 = vmatprep.subr.bf16.mxu0 %v3476_v10 }
  0xfe   :  { %4548 = vmatpush3.bf16.msra.mxu1 %v3483_v9 }
  0xff   :  { %4550 = vmatprep.subr.bf16.mxu1 %v3492_v11 }
 0x100   :  { %4520 = vmatpush3.bf16.msra.mxu0 %v3468_v12 }
 0x101   :  { %4522 = vmatprep.subr.bf16.mxu0 %v3477_v14 }
 0x102   :  { %4552 = vmatpush3.bf16.msra.mxu1 %v3484_v13 }
 0x103   :  { %4554 = vmatprep.subr.bf16.mxu1 %v3493_v15 }
 0x104   :  { %4524 = vmatpush3.bf16.msra.mxu0 %v3469_v16 }
 0x105   :  { %4526 = vmatprep.subr.bf16.mxu0 %v3478_v18 }
 0x106   :  { %4556 = vmatpush3.bf16.msra.mxu1 %v3485_v17  ;;  %v3529_v22 = vpop.f32.mrb[0].mxu0 }
 0x107   :  { %4558 = vmatprep.subr.bf16.mxu1 %v3494_v19  ;;  %v3530_v27 = vpop.f32.mrb[1].mxu0 }
 0x108   :  { %v3564_v23 = vpop.f32.mrb[0].mxu1  ;;  %v3531_v29 = vadd.f32 %v3530_v27, %v3529_v22  ;;  %4528 = vmatpush3.bf16.msra.mxu0 %v3470_v20 }
 0x109   :  { %v3565_v28 = vpop.f32.mrb[1].mxu1  ;;  %4530 = vmatprep.subr.bf16.mxu0 %v3479_v24 }
 0x10a   :  { %v3566_v30 = vadd.f32 %v3565_v28, %v3564_v23  ;;  %4560 = vmatpush3.bf16.msra.mxu1 %v3486_v21  ;;  %v1158_v33 = vadd.f32 %v3531_v29, %v2217_v26 }
 0x10b   :  { %4562 = vmatprep.subr.bf16.mxu1 %v3495_v25 }
 0x10c   :  { %v1228_v36 = vadd.f32 %v3566_v30, %v1158_v33  ;;  %4532 = vmatpush3.bf16.msra.mxu0 %v3471_v31 }
 0x10d   :  { %4534 = vmatprep.subr.bf16.mxu0 %v3480_v34 }
 0x10e   :  { %4564 = vmatpush3.bf16.msra.mxu1 %v3487_v32 }
 0x10f   :  { %4566 = vmatprep.subr.bf16.mxu1 %v3496_v35 }
 0x110   :  { %4536 = vmatpush3.bf16.msra.mxu0 %v3472_v37 }
 0x112   :  { %4568 = vmatpush3.bf16.msra.mxu1 %v3488_v38 }
 0x113   :  { %2136 = vmatmul.mubr.f32.vlgmr.msra.gmra.mrb[14].mxu0 %v56_v39 }
 0x115   :  { %2206 = vmatmul.mubr.f32.vlgmr.msra.gmra.mrb[14].mxu1 %v58_v40 }
 0x126   :  { %v3599_v41 = vpop.f32.mrb[2].mxu0 }
 0x127   :  { %v3600_v43 = vpop.f32.mrb[3].mxu0 }
 0x128   :  { %v3634_v42 = vpop.f32.mrb[2].mxu1  ;;  %v3601_v45 = vadd.f32 %v3600_v43, %v3599_v41 }
 0x129   :  { %v3635_v44 = vpop.f32.mrb[3].mxu1 }
 0x12a   :  { %v3636_v46 = vadd.f32 %v3635_v44, %v3634_v42  ;;  %v1298_v47 = vadd.f32 %v3601_v45, %v1228_v36 }
 0x12c   :  { %v1368_v48 = vadd.f32 %v3636_v46, %v1298_v47 }
 0x146   :  { %v3669_v49 = vpop.f32.mrb[4].mxu0 }
 0x147   :  { %v3670_v51 = vpop.f32.mrb[5].mxu0 }
 0x148   :  { %v3704_v50 = vpop.f32.mrb[4].mxu1  ;;  %v3671_v53 = vadd.f32 %v3670_v51, %v3669_v49 }
 0x149   :  { %v3705_v52 = vpop.f32.mrb[5].mxu1 }
 0x14a   :  { %v3706_v54 = vadd.f32 %v3705_v52, %v3704_v50  ;;  %v1438_v55 = vadd.f32 %v3671_v53, %v1368_v48 }
 0x14c   :  { %v1508_v56 = vadd.f32 %v3706_v54, %v1438_v55 }
 0x166   :  { %v3739_v57 = vpop.f32.mrb[6].mxu0 }
 0x167   :  { %v3740_v59 = vpop.f32.mrb[7].mxu0 }
 0x168   :  { %v3774_v58 = vpop.f32.mrb[6].mxu1  ;;  %v3741_v61 = vadd.f32 %v3740_v59, %v3739_v57 }
 0x169   :  { %v3775_v60 = vpop.f32.mrb[7].mxu1 }
 0x16a   :  { %v3776_v62 = vadd.f32 %v3775_v60, %v3774_v58  ;;  %v1578_v63 = vadd.f32 %v3741_v61, %v1508_v56 }
 0x16c   :  { %v1648_v0 = vadd.f32 %v3776_v62, %v1578_v63 }
 0x186   :  { %v3809_v1 = vpop.f32.mrb[8].mxu0 }
 0x187   :  { %v3810_v3 = vpop.f32.mrb[9].mxu0 }
 0x188   :  { %v3844_v2 = vpop.f32.mrb[8].mxu1  ;;  %v3811_v5 = vadd.f32 %v3810_v3, %v3809_v1 }
 0x189   :  { %v3845_v4 = vpop.f32.mrb[9].mxu1 }
 0x18a   :  { %v3846_v6 = vadd.f32 %v3845_v4, %v3844_v2  ;;  %v1718_v7 = vadd.f32 %v3811_v5, %v1648_v0 }
 0x18c   :  { %v1788_v8 = vadd.f32 %v3846_v6, %v1718_v7 }
 0x1a6   :  { %v3879_v9 = vpop.f32.mrb[10].mxu0 }
 0x1a7   :  { %v3880_v11 = vpop.f32.mrb[11].mxu0 }
 0x1a8   :  { %v3914_v10 = vpop.f32.mrb[10].mxu1  ;;  %v3881_v13 = vadd.f32 %v3880_v11, %v3879_v9 }
 0x1a9   :  { %v3915_v12 = vpop.f32.mrb[11].mxu1 }
 0x1aa   :  { %v3916_v14 = vadd.f32 %v3915_v12, %v3914_v10  ;;  %v1858_v15 = vadd.f32 %v3881_v13, %v1788_v8 }
 0x1ac   :  { %v1928_v16 = vadd.f32 %v3916_v14, %v1858_v15 }
 0x1c6   :  { %v3949_v17 = vpop.f32.mrb[12].mxu0 }
 0x1c7   :  { %v3950_v19 = vpop.f32.mrb[13].mxu0 }
 0x1c8   :  { %v3984_v18 = vpop.f32.mrb[12].mxu1  ;;  %v3951_v21 = vadd.f32 %v3950_v19, %v3949_v17 }
 0x1c9   :  { %v3985_v20 = vpop.f32.mrb[13].mxu1 }
 0x1ca   :  { %v3986_v22 = vadd.f32 %v3985_v20, %v3984_v18  ;;  %v1998_v23 = vadd.f32 %v3951_v21, %v1928_v16 }
 0x1cc   :  { %v2068_v24 = vadd.f32 %v3986_v22, %v1998_v23 }
 0x1e6   :  { %v4019_v25 = vpop.f32.mrb[14].mxu0 }
 0x1e7   :  { %v4020_v27 = vpop.f32.mrb[15].mxu0 }
 0x1e8   :  { %v4054_v26 = vpop.f32.mrb[14].mxu1  ;;  %v4021_v29 = vadd.f32 %v4020_v27, %v4019_v25 }
 0x1e9   :  { %v4055_v28 = vpop.f32.mrb[15].mxu1 }
 0x1ea   :  { %v4056_v30 = vadd.f32 %v4055_v28, %v4054_v26  ;;  %v2138_v31 = vadd.f32 %v4021_v29, %v2068_v24 }
 0x1ec   :  { %v2208_v32 = vadd.f32 %v4056_v30, %v2138_v31 }
 0x1ee   :  { %2211 = vst [vmem:[%s4736_s3] sm:$0xff] %v2208_v32 }
 0x1ef   :  { %2216 = vsyncpa [#allocation3], 1 }

</bundles_post_ra>
